<compile_context>
chip_gen: v7x
topology: tpu7x:2x2x1
jax: 0.10.0
libtpu: 0.0.40
codegen_flags: <defaults>
</compile_context>

<pallas_src>
import math

import jax
import jax.numpy as jnp
from jax.experimental import pallas as pl
from jax.experimental.pallas import tpu as pltpu


# ----------------------------------------------------------------------------- helpers
def _cdiv(a, b):
    return (a + b - 1) // b


def _round_up(x, m):
    return _cdiv(x, m) * m


def _sublane_pack(itemsize):
    # sub-32-bit dtypes pack along sublanes: native sublane granule is 8*pack rows.
    return max(1, 4 // itemsize)


def _padded_tile_bytes(rows, cols, itemsize):
    """Bytes a (rows, cols) VMEM tile really occupies after (8*pack, 128) padding."""
    p = _sublane_pack(itemsize)
    return _round_up(rows, 8 * p) * _round_up(cols, 128) * itemsize


def _per_step_budget_bytes():
    # ~1 MiB/step on v7x (64 MiB VMEM, 3.2 TB/s HBM); ~4 MiB/step on v5e/v6e
    # (128 MiB VMEM, slower HBM -> bigger tiles amortize the ~0.35us/step cost).
    try:
        cap = int(pltpu.get_tpu_info().vmem_capacity_bytes)
    except Exception:
        cap = 64 << 20  # be conservative if the query is unavailable
    return (1 << 20) if cap <= (64 << 20) else (4 << 20)


def _vmem_limit_bytes(step_bytes):
    # double-buffered (in + out) padded tiles + headroom, capped at 32 MiB
    # (safe on v7x's 64 MiB physical VMEM; trivially fine on v5e/v6e).
    needed = 2 * step_bytes + (2 << 20)
    limit = min(max(needed, 16 << 20), 32 << 20)
    return int(max(limit, needed))


# ----------------------------------------------------------------------------- kernels
def _transpose_kernel(x_ref, o_ref):
    # x_ref: (tHW, C); o_ref: (C, tHW) -> lane dim tHW is 128-aligned => dense stores.
    o_ref[...] = x_ref[...].T


def _make_packed_kernel(c):
    def kernel(x_ref, o_ref):
        # x_ref: (tR, k*C) lane-dense tile holding k spatial positions per row.
        # Deinterleave in VMEM to (tR*k, C), then transpose to (C, tR*k).
        o_ref[...] = x_ref[...].reshape(-1, c).T
    return kernel


# ----------------------------------------------------------------------------- drivers
def _permute_simple(x2, B, HW, C, itemsize):
    """x2: (B, HW, C) -> (B, C, HW) via per-tile 2D transpose (lane-sparse input)."""
    budget = _per_step_budget_bytes()
    if HW <= 128:
        thw = HW  # full extent (legal even when not 128-aligned)
    else:
        p8 = 8 * _sublane_pack(itemsize)
        # bytes contributed per row of the tile, with (8*pack,128) padding applied
        per_row = (_round_up(C, 128) + _round_up(C, p8)) * itemsize
        thw = max(128, (budget // per_row) // 128 * 128)
        thw = min(thw, (HW // 128) * 128)
        if B == 1:
            # keep >= 2 spatial tiles so both v7x TensorCores get work
            thw = min(thw, max(128, _round_up(_cdiv(HW, 2), 128)))
    n_spatial = _cdiv(HW, thw)  # ragged last block is clipped by Pallas
    step_bytes = (_padded_tile_bytes(thw, C, itemsize)
                  + _padded_tile_bytes(C, thw, itemsize))

    return pl.pallas_call(
        _transpose_kernel,
        out_shape=jax.ShapeDtypeStruct((B, C, HW), x2.dtype),
        grid_spec=pltpu.PrefetchScalarGridSpec(
            num_scalar_prefetch=0,
            grid=(B, n_spatial),
            in_specs=[pl.BlockSpec((pl.Squeezed(), thw, C), lambda b, s: (b, s, 0))],
            out_specs=pl.BlockSpec((pl.Squeezed(), C, thw), lambda b, s: (b, 0, s)),
        ),
        compiler_params=pltpu.CompilerParams(
            dimension_semantics=("parallel", "parallel"),
            vmem_limit_bytes=_vmem_limit_bytes(step_bytes),
        ),
        cost_estimate=pl.CostEstimate(
            flops=0, transcendentals=0,
            bytes_accessed=int(2 * B * HW * C * itemsize)),
    )(x2)


def _permute_packed(x2, B, HW, C, itemsize):
    """Small-C path: dense 128-lane DMA rows, deinterleave + transpose in-kernel."""
    k = 128 // math.gcd(C, 128)           # smallest k with (k*C) % 128 == 0
    kc = k * C
    R = HW // k                           # packed spatial rows (caller checked HW % k == 0)
    xp = x2.reshape(B, R, kc)             # free view: same memory order

    p8 = 8 * _sublane_pack(itemsize)
    lane_req = 128 // math.gcd(k, 128)    # ensures (tR*k) % 128 == 0
    tr_step = p8 * lane_req // math.gcd(p8, lane_req)   # lcm(8*pack, lane_req)

    budget = _per_step_budget_bytes()
    if R <= tr_step:
        tr = R                            # full extent
    else:
        per_row = (_round_up(kc, 128) + _round_up(C, p8) * k) * itemsize
        tr = max(tr_step, (budget // per_row) // tr_step * tr_step)
        tr = min(tr, (R // tr_step) * tr_step)
        if B == 1:
            tr = min(tr, max(tr_step, _round_up(_cdiv(R, 2), tr_step)))
    n_spatial = _cdiv(R, tr)
    step_bytes = (_padded_tile_bytes(tr, kc, itemsize)
                  + _padded_tile_bytes(C, tr * k, itemsize))

    return pl.pallas_call(
        _make_packed_kernel(C),
        out_shape=jax.ShapeDtypeStruct((B, C, HW), x2.dtype),
        grid_spec=pltpu.PrefetchScalarGridSpec(
            num_scalar_prefetch=0,
            grid=(B, n_spatial),
            in_specs=[pl.BlockSpec((pl.Squeezed(), tr, kc), lambda b, s: (b, s, 0))],
            out_specs=pl.BlockSpec((pl.Squeezed(), C, tr * k), lambda b, s: (b, 0, s)),
        ),
        compiler_params=pltpu.CompilerParams(
            dimension_semantics=("parallel", "parallel"),
            vmem_limit_bytes=_vmem_limit_bytes(step_bytes),
        ),
        cost_estimate=pl.CostEstimate(
            flops=0, transcendentals=0,
            bytes_accessed=int(2 * B * HW * C * itemsize)),
    )(xp)


def bhwc2bchw(x, *, allow_packed=True):
    """(B, H, W, C) -> (B, C, H, W); exact equivalent of torch permute([0, 3, 1, 2])."""
    B, H, W, C = x.shape
    HW = H * W
    itemsize = jnp.dtype(x.dtype).itemsize
    x2 = x.reshape(B, HW, C)              # free view of the BHWC layout

    if allow_packed and C * itemsize < 512:
        k = 128 // math.gcd(C, 128)
        if k > 1 and HW % k == 0:
            try:
                out2 = _permute_packed(x2, B, HW, C, itemsize)
                return out2.reshape(B, C, H, W)
            except Exception:
                # Mosaic couldn't lower the in-kernel deinterleave for this
                # shape/dtype: fall back to the plain lane-sparse transpose.
                pass
    out2 = _permute_simple(x2, B, HW, C, itemsize)
    return out2.reshape(B, C, H, W)       # free view back to (B, C, H, W)


if __name__ == "__main__":
    key = jax.random.PRNGKey(0)

    # Primary shape implied by the module's usage (NHWC activations, small C).
    B, H, W, C = 2, 16, 16, 4
    x = jax.random.normal(key, (B, H, W, C), dtype=jnp.float32)
    ref = jnp.transpose(x, (0, 3, 1, 2))
    out = jax.block_until_ready(bhwc2bchw(x))
    assert out.shape == (B, C, H, W), out.shape
    assert out.dtype == x.dtype
    assert jnp.array_equal(out, ref), "mismatch vs reference permute (packed/aligned path)"

    # Non-128-aligned spatial extent with B == 1: exercises the cdiv grid with a
    # clipped ragged tile and the single-batch spatial split (megacore).
    x2 = jax.random.normal(jax.random.PRNGKey(0), (1, 18, 10, 4), dtype=jnp.float32)
    ref2 = jnp.transpose(x2, (0, 3, 1, 2))
    out2 = jax.block_until_ready(bhwc2bchw(x2))
    assert out2.shape == (1, 4, 18, 10)
    assert jnp.array_equal(out2, ref2), "mismatch vs reference permute (ragged path)"

    print("KERNEL_OK")
</pallas_src>

<mosaic_0001>
module attributes {stable_mosaic.version = 11 : i64} {
  func.func @kernel(%arg0: i32, %arg1: i32, %arg2: memref<1x8x128xf32, #tpu.memory_space<vmem>>, %arg3: memref<1x4x256xf32, #tpu.memory_space<vmem>>) attributes {dimension_semantics = [#tpu.dimension_semantics<parallel>, #tpu.dimension_semantics<parallel>], iteration_bounds = array<i64: 2, 1>, scalar_prefetch = 0 : i64, scratch_operands = 0 : i64, tpu.core_type = #tpu.core_type<tc>, window_params = [{transform_indices = @transform_0, window_bounds = array<i64: 1, 8, 128>}, {transform_indices = @transform_1, window_bounds = array<i64: 1, 4, 256>}]} {
    %c0 = arith.constant 0 : index
    %c0_0 = arith.constant 0 : index
    %c0_1 = arith.constant 0 : index
    %0 = vector.load %arg2[%c0, %c0_0, %c0_1] : memref<1x8x128xf32, #tpu.memory_space<vmem>>, vector<1x8x128xf32>
    %1 = vector.shape_cast %0 : vector<1x8x128xf32> to vector<8x128xf32>
    %2 = vector.shape_cast %1 : vector<8x128xf32> to vector<256x4xf32>
    %3 = tpu.transpose %2, [1, 0] : vector<256x4xf32> -> vector<4x256xf32>
    %c0_2 = arith.constant 0 : index
    %c0_3 = arith.constant 0 : index
    %c0_4 = arith.constant 0 : index
    %4 = vector.load %arg3[%c0_2, %c0_3, %c0_4] : memref<1x4x256xf32, #tpu.memory_space<vmem>>, vector<1x4x256xf32>
    %5 = vector.shape_cast %4 : vector<1x4x256xf32> to vector<4x256xf32>
    %6 = vector.shape_cast %3 : vector<4x256xf32> to vector<1x4x256xf32>
    tpu.vector_store %arg3[%c0_2, %c0_3, %c0_4], %6 {strides = array<i32>} : memref<1x4x256xf32, #tpu.memory_space<vmem>>, vector<1x4x256xf32>,
    return
  }
  func.func @transform_0(%arg0: i32, %arg1: i32) -> (i32, i32, i32) {
    %c0_i32 = arith.constant 0 : i32
    %c0_i32_0 = arith.constant 0 : i32
    return %arg0, %arg1, %c0_i32 : i32, i32, i32
  }
  func.func @transform_1(%arg0: i32, %arg1: i32) -> (i32, i32, i32) {
    %c0_i32 = arith.constant 0 : i32
    %c0_i32_0 = arith.constant 0 : i32
    return %arg0, %c0_i32, %arg1 : i32, i32, i32
  }
}

module attributes {stable_mosaic.version = 11 : i64} {
  func.func @_transpose_kernel(%arg0: i32, %arg1: i32, %arg2: memref<1x256x4xf32, #tpu.memory_space<vmem>>, %arg3: memref<1x4x256xf32, #tpu.memory_space<vmem>>) attributes {dimension_semantics = [#tpu.dimension_semantics<parallel>, #tpu.dimension_semantics<parallel>], iteration_bounds = array<i64: 2, 1>, scalar_prefetch = 0 : i64, scratch_operands = 0 : i64, tpu.core_type = #tpu.core_type<tc>, window_params = [{transform_indices = @transform_0, window_bounds = array<i64: 1, 256, 4>}, {transform_indices = @transform_1, window_bounds = array<i64: 1, 4, 256>}]} {
    %c0 = arith.constant 0 : index
    %c0_0 = arith.constant 0 : index
    %c0_1 = arith.constant 0 : index
    %0 = vector.load %arg2[%c0, %c0_0, %c0_1] : memref<1x256x4xf32, #tpu.memory_space<vmem>>, vector<1x256x4xf32>
    %1 = vector.shape_cast %0 : vector<1x256x4xf32> to vector<256x4xf32>
    %2 = tpu.transpose %1, [1, 0] : vector<256x4xf32> -> vector<4x256xf32>
    %c0_2 = arith.constant 0 : index
    %c0_3 = arith.constant 0 : index
    %c0_4 = arith.constant 0 : index
    %3 = vector.load %arg3[%c0_2, %c0_3, %c0_4] : memref<1x4x256xf32, #tpu.memory_space<vmem>>, vector<1x4x256xf32>
    %4 = vector.shape_cast %3 : vector<1x4x256xf32> to vector<4x256xf32>
    %5 = vector.shape_cast %2 : vector<4x256xf32> to vector<1x4x256xf32>
    tpu.vector_store %arg3[%c0_2, %c0_3, %c0_4], %5 {strides = array<i32>} : memref<1x4x256xf32, #tpu.memory_space<vmem>>, vector<1x4x256xf32>,
    return
  }
  func.func @transform_0(%arg0: i32, %arg1: i32) -> (i32, i32, i32) {
    %c0_i32 = arith.constant 0 : i32
    %c0_i32_0 = arith.constant 0 : i32
    return %arg0, %arg1, %c0_i32 : i32, i32, i32
  }
  func.func @transform_1(%arg0: i32, %arg1: i32) -> (i32, i32, i32) {
    %c0_i32 = arith.constant 0 : i32
    %c0_i32_0 = arith.constant 0 : i32
    return %arg0, %c0_i32, %arg1 : i32, i32, i32
  }
}

</mosaic_0001>

<bundles_post_ra>
// kernel: tpu_custom_call.1
= control target key start
LH: loop header
LB: loop body
LE: loop exit
PB: predicated region body
PF: predicated region fallthrough
CT: control target
= control target key end

     0   :  { %6 = vsyncpa [#allocation3], 0  ;;  %s647_s0 = inlined_call_operand.vmem [shape: f32[2,256,4], index: 0, kind: input, shape index: {}]   ;;  %s648_s1 = inlined_call_operand.hbm [shape: f32[2,4,256], index: 1, kind: output, shape index: {}]  }
   0x1   :  { %8 = vsyncpa [#allocation3 + $0x1], 0  ;;  %s501_s6 = smov 0   ;;  %s503_s7 = smov 0  }
   0x2   :  { %s505_s8 = smov 0   ;;  %s507_s9 = smov 0  }
   0x3   :  { %s509_s10 = smov 0   ;;  %s511_s11 = smov 0  }
   0x4 LB: > { %s340_s12 = sadd.s32 4294967295, %s488_s11   ;;  %s341_s13 = sadd.s32 4294967294, %s488_s11   ;;  %s488_s11 = sphi %s511_s11, %s14_s11   ;;  %s484_s10 = sphi %s509_s10, %s655_s10   ;;  %s480_s9 = sphi %s507_s9, %s654_s9   ;;  %s476_s8 = sphi %s505_s8, %s653_s8   ;;  %s472_s7 = sphi %s503_s7, %s652_s7   ;;  %s468_s6 = sphi %s501_s6, %s651_s6  }
   0x5   : > { %s26_s14 = sadd.s32 1, %s484_s10  ;;  %s63_s15 = sadd.s32 1, %s476_s8 }
   0x6   : > { %p28_p0 = scmp.ge.s32.totalorder %s26_s14, 2  ;;  %p73_p1 = scmp.ne.s32.totalorder %s476_s8, %s472_s7 }
   0x7   : > { %p74_p2 = scmp.eq.s32.totalorder %s340_s12, 1  ;;  %p79_p3 = scmp.ne.s32.totalorder %s472_s7, %s468_s6 }
   0x8   : > { %s657_s14 = smov (%p28_p0, %s26_s14), 0  ;;  %p80_p5 = scmp.eq.s32.totalorder %s341_s13, 1 }
   0x9   : > { %p541_p4 = por %p74_p2, %p73_p1  ;;  %s58_s17 = ssub.s32 %s484_s10, %s657_s14 }
   0xa   : > { %p344_p6 = scmp.ge.s32.totalorder %s488_s11, 1  ;;  %p61_p7 = scmp.eq.s32.totalorder %s58_s17, 0 }
   0xb   : > { %p548_p8 = por %p80_p5, %p79_p3  ;;  %p111_p9 = scmp.lt.s32.totalorder %s488_s11, 3 }
   0xc   : > { %s554_s19 = scalar_select %p61_p7, %s476_s8, %s63_s15  }
   0xd   : > { %p112_p10 = pnand %p344_p6, %p111_p9 }
   0xe   : > { %p136_p11 = scmp.lt.s32.totalorder (!%p112_p10), %s480_s9, 1  ;;  %s132_s25 = sand.u32 (!%p112_p10), 1, %s472_s7  }
   0xf   : > { %115 = sbr.rel (%p112_p10) target bundleno = 173 (0xad), region = 24  ;;  %s345_s26 = sshll.u32 (!%p112_p10), %s132_s25, 3 }
  0x10   : > { %s354_s27 = sshll.u32 (!%p112_p10), %s480_s9, 7  ;;  %s134_s28 = scalar_lea.vmem (!%p112_p10), [#allocation2], %s345_s26 }
  0x11   : > { %s264_s29 = sshll.u32 (!%p112_p10), %s134_s28, 4  ;;  %s600_s3 = scalar_lea.hbm (!%p112_p10), %s648_s1, %s354_s27  ;;  %s602_s29 = int_to_ptr.vmem [resolvable:$true] %s264_s29 }
  0x12   : > { %s248_s4 = scalar_lea.sflag (!%p112_p10), [#allocation3], %s132_s25  ;;  %s410_s5 = scalar_lea.vmem (!%p112_p10), %s602_s29, 128 }
  0x13   : > { %p411_p12 = scmp.ne.s32.totalorder (!%p112_p10), %s602_s29, %s410_s5 }
  0x15   : > { %p412_p13 = pnand (!%p112_p10), %p411_p12, %p541_p4 }
  0x16   : > { %s137_s20 = scalar_select %p136_p11, %s480_s9, 1 }
  0x17   : > { %p413_p0 = pneg %p412_p13  ;;  %s490_s9 = smov [#allocation2]  }
  0x18   : > { %s353_s21 = sshll.u32 %s137_s20, 8  ;;  %s414_s12 = sshll.u32 %s490_s9, 4  ;;  %s415_s12 = int_to_ptr.vmem [resolvable:$false] %s414_s12 }
  0x19   : > { %s561_s24 = scalar_lea.vmem %s647_s0, %s353_s21  ;;  %s416_s13 = scalar_lea.vmem %s415_s12, 256 }
  0x1a   : > { %v162_v0 = vld [vmem:[%s561_s24 + $0x80] sm:$0xff]  ;;  %v163_v2 = vld [vmem:[%s561_s24 + $0x88] sm:$0xff]  ;;  %v164_v4 = vld [vmem:[%s561_s24 + $0x90] sm:$0xff]  ;;  %p417_p1 = scmp.lt.s32.totalorder %s602_s29, %s415_s12  ;;  %p418_p2 = scmp.lt.s32.totalorder %s416_s13, %s410_s5 }
  0x1b   : > { %v146_v1 = vld [vmem:[%s561_s24] sm:$0xff]  ;;  %210 = vxpose.xlu1.b32.start [1/16] (narrow) %v162_v0, 8  ;;  %v147_v3 = vld [vmem:[%s561_s24 + $0x8] sm:$0xff]  ;;  %v148_v5 = vld [vmem:[%s561_s24 + $0x10] sm:$0xff] }
  0x1c   : > { %178 = vxpose.xlu0.b32.start [1/16] (narrow) %v146_v1, 8  ;;  %v165_v6 = vld [vmem:[%s561_s24 + $0x98] sm:$0xff]  ;;  %v166_v8 = vld [vmem:[%s561_s24 + $0xa0] sm:$0xff]  ;;  %v167_v10 = vld [vmem:[%s561_s24 + $0xa8] sm:$0xff]  ;;  %p419_p3 = por %p418_p2, %p417_p1 }
  0x1d   : > { %v149_v7 = vld [vmem:[%s561_s24 + $0x18] sm:$0xff]  ;;  %v150_v9 = vld [vmem:[%s561_s24 + $0x20] sm:$0xff]  ;;  %v151_v11 = vld [vmem:[%s561_s24 + $0x28] sm:$0xff] }
  0x1e   : > { %v168_v12 = vld [vmem:[%s561_s24 + $0xb0] sm:$0xff]  ;;  %v169_v14 = vld [vmem:[%s561_s24 + $0xb8] sm:$0xff]  ;;  %v170_v16 = vld [vmem:[%s561_s24 + $0xc0] sm:$0xff]  ;;  %p420_p5 = pnand %p419_p3, %p413_p0 }
  0x1f   : > { %211 = vxpose.xlu1.b32.cont [2/16] (narrow) %v163_v2, 8  ;;  %v152_v13 = vld [vmem:[%s561_s24 + $0x30] sm:$0xff]  ;;  %v153_v15 = vld [vmem:[%s561_s24 + $0x38] sm:$0xff]  ;;  %v154_v17 = vld [vmem:[%s561_s24 + $0x40] sm:$0xff] }
  0x20   : > { %179 = vxpose.xlu0.b32.cont [2/16] (narrow) %v147_v3, 8  ;;  %v171_v18 = vld [vmem:[%s561_s24 + $0xc8] sm:$0xff]  ;;  %v172_v20 = vld [vmem:[%s561_s24 + $0xd0] sm:$0xff]  ;;  %v173_v22 = vld [vmem:[%s561_s24 + $0xd8] sm:$0xff] }
  0x21   : > { %v155_v19 = vld [vmem:[%s561_s24 + $0x48] sm:$0xff]  ;;  %v156_v21 = vld [vmem:[%s561_s24 + $0x50] sm:$0xff]  ;;  %v157_v23 = vld [vmem:[%s561_s24 + $0x58] sm:$0xff] }
  0x22   : > { %v174_v24 = vld [vmem:[%s561_s24 + $0xe0] sm:$0xff]  ;;  %v175_v26 = vld [vmem:[%s561_s24 + $0xe8] sm:$0xff]  ;;  %v176_v28 = vld [vmem:[%s561_s24 + $0xf0] sm:$0xff] }
  0x23   : > { %212 = vxpose.xlu1.b32.cont [3/16] (narrow) %v164_v4, 8  ;;  %v158_v25 = vld [vmem:[%s561_s24 + $0x60] sm:$0xff]  ;;  %v159_v27 = vld [vmem:[%s561_s24 + $0x68] sm:$0xff]  ;;  %v160_v29 = vld [vmem:[%s561_s24 + $0x70] sm:$0xff] }
  0x24   : > { %180 = vxpose.xlu0.b32.cont [3/16] (narrow) %v148_v5, 8  ;;  %v177_v30 = vld [vmem:[%s561_s24 + $0xf8] sm:$0xff] }
  0x25   : > { %v161_v31 = vld [vmem:[%s561_s24 + $0x78] sm:$0xff] }
  0x27   : > { %213 = vxpose.xlu1.b32.cont [4/16] (narrow) %v165_v6, 8 }
  0x28   : > { %181 = vxpose.xlu0.b32.cont [4/16] (narrow) %v149_v7, 8 }
  0x2b   : > { %214 = vxpose.xlu1.b32.cont [5/16] (narrow) %v166_v8, 8 }
  0x2c   : > { %182 = vxpose.xlu0.b32.cont [5/16] (narrow) %v150_v9, 8 }
  0x2f   : > { %215 = vxpose.xlu1.b32.cont [6/16] (narrow) %v167_v10, 8 }
  0x30   : > { %183 = vxpose.xlu0.b32.cont [6/16] (narrow) %v151_v11, 8 }
  0x33   : > { %216 = vxpose.xlu1.b32.cont [7/16] (narrow) %v168_v12, 8 }
  0x34   : > { %184 = vxpose.xlu0.b32.cont [7/16] (narrow) %v152_v13, 8 }
  0x37   : > { %217 = vxpose.xlu1.b32.cont [8/16] (narrow) %v169_v14, 8 }
  0x38   : > { %185 = vxpose.xlu0.b32.cont [8/16] (narrow) %v153_v15, 8 }
  0x3b   : > { %218 = vxpose.xlu1.b32.cont [9/16] (narrow) %v170_v16, 8 }
  0x3c   : > { %186 = vxpose.xlu0.b32.cont [9/16] (narrow) %v154_v17, 8 }
  0x3f   : > { %219 = vxpose.xlu1.b32.cont [10/16] (narrow) %v171_v18, 8 }
  0x40   : > { %187 = vxpose.xlu0.b32.cont [10/16] (narrow) %v155_v19, 8 }
  0x43   : > { %220 = vxpose.xlu1.b32.cont [11/16] (narrow) %v172_v20, 8 }
  0x44   : > { %188 = vxpose.xlu0.b32.cont [11/16] (narrow) %v156_v21, 8 }
  0x47   : > { %221 = vxpose.xlu1.b32.cont [12/16] (narrow) %v173_v22, 8 }
  0x48   : > { %189 = vxpose.xlu0.b32.cont [12/16] (narrow) %v157_v23, 8 }
  0x4b   : > { %222 = vxpose.xlu1.b32.cont [13/16] (narrow) %v174_v24, 8 }
  0x4c   : > { %190 = vxpose.xlu0.b32.cont [13/16] (narrow) %v158_v25, 8 }
  0x4f   : > { %223 = vxpose.xlu1.b32.cont [14/16] (narrow) %v175_v26, 8 }
  0x50   : > { %191 = vxpose.xlu0.b32.cont [14/16] (narrow) %v159_v27, 8 }
  0x53   : > { %224 = vxpose.xlu1.b32.cont [15/16] (narrow) %v176_v28, 8 }
  0x54   : > { %192 = vxpose.xlu0.b32.cont [15/16] (narrow) %v160_v29, 8 }
  0x57   : > { %225 = vxpose.xlu1.b32.end [16/16] (narrow) %v177_v30, 8 }
  0x58   : > { %193 = vxpose.xlu0.b32.end [16/16] (narrow) %v161_v31, 8 }
  0x9b   : > { %v226_v32 = vpop.trf.xlu1 }
  0x9c   : > { %v194_v33 = vpop.trf.xlu0 }
  0x9d   : > { %v244_v34 = vcombine.low %v194_v33, %v226_v32 }
  0x9f   : > { %246 = vst [vmem:[%s134_s28] sm:$0xff] %v244_v34 }
  0xa0   : > { %423 = shalt.err (!%p420_p5)
}
  0xa1   : > { %s424_s15 = scalar_lea.hbm %s600_s3, 128  ;;  %s428_s21 = scalar_lea.hbm %s648_s1, 256 }
  0xa2   : > { %p425_p6 = scmp.ne.s32.totalorder %s600_s3, %s424_s15  ;;  %p429_p10 = scmp.lt.u32.totalorder %s600_s3, %s648_s1 }
  0xa3   : > { %p430_p11 = scmp.lt.u32.totalorder %s428_s21, %s424_s15  ;;  %p432_p13 = scmp.lt.u32.totalorder %s424_s15, %s600_s3 }
  0xa4   : > { %p426_p7 = pnand %p425_p6, %p541_p4 }
  0xa5   : > { %p431_p12 = por %p430_p11, %p429_p10 }
  0xa6   : > { %p427_p9 = pneg %p426_p7 }
  0xa7   : > { %p433_p0 = por %p432_p13, %p431_p12 }
  0xa9   : > { %p434_p1 = pnand %p433_p0, %p427_p9 }
  0xab   : > { %437 = shalt.err (!%p434_p1)
}
  0xac   : > { %355 = dma.vmem_to_hbm [thread:$0]  (%p541_p4), %s602_s29, 128, %s600_s3, %s248_s4  }
  0xad PF: > { %p361_p2 = scmp.ge.s32.totalorder %s488_s11, 2  ;;  %s276_s24 = sand.u32 1, %s468_s6  }
  0xae   : > { %s277_s25 = scalar_lea.sflag [#allocation3], %s276_s24 }
  0xaf   : > { %p358_p3 = pnand %p361_p2, %p548_p8 }
  0xb1   : > { %463 = dma.done.wait (!%p358_p3), %s277_s25, 128  }
  0xb2   : > { %465 = vsyncadd (!%p358_p3), %s277_s25, 4294967168  ;;  %s14_s11 = sadd.s32 1, %s488_s11   ;;  %s651_s6 = smov %s472_s7 }
  0xb3   : > { %p11_p5 = scmp.ge.s32.totalorder %s14_s11, 4   ;;  %s652_s7 = smov %s476_s8 }
  0xb4   : > { %s653_s8 = smov %s554_s19  ;;  %s654_s9 = smov %s484_s10 }
  0xb5   : > { %s655_s10 = smov %s657_s14  ;;  %13 = sbr.rel (!%p11_p5) target bundleno = 4 (0x4), region = 59 }
  0xbc   :  { %282 = vsyncpa [#allocation3], 1 }
  0xbd   :  { %284 = vsyncpa [#allocation3 + $0x1], 1 }

</bundles_post_ra>
